<compile_context>
chip_gen: v5e
topology: v5e:2x2
jax: 0.10.0
libtpu: 0.0.40
codegen_flags: <defaults>
</compile_context>

<pallas_src>
import jax
import jax.numpy as jnp
from jax.experimental import pallas as pl
from jax.experimental.pallas import tpu as pltpu


def _matmul_kernel(w_ref, p_ref, o_ref):
    # w_ref: (OC_pad, CKK_pad)  flattened conv weight with bias folded in
    # p_ref: (CKK_pad, bm)      im2col patch block (+ ones row), bm % 128 == 0
    # o_ref: (OC_pad, bm)       lane-dense output block
    o_ref[...] = jnp.dot(
        w_ref[...], p_ref[...], preferred_element_type=jnp.float32
    ).astype(o_ref.dtype)


def conv2d_pallas(x_nchw, w_oihw, bias, *, interpret=False):
    """Conv2d, stride=1, padding=0, matching torch.nn.Conv2d semantics.

    x_nchw: (N, C, H, W) float32
    w_oihw: (OC, C, KH, KW) float32
    bias:   (OC,) float32
    returns (N, OC, OH, OW) float32
    """
    N, C, H, W = x_nchw.shape
    OC, C2, KH, KW = w_oihw.shape
    assert C == C2
    OH, OW = H - KH + 1, W - KW + 1
    M = N * OH * OW
    CKK = C * KH * KW
    CKKb = CKK + 1                                  # + ones row (folded bias)
    CKK_pad = ((CKKb + 31) // 32) * 32              # tile-aligned contraction
    OC_pad = ((OC + 7) // 8) * 8                    # sublane-aligned rows

    # Lane-dense M tiling: one grid step at small sizes; for scaled-up shapes
    # tile M (W stays resident) so P/out are double-buffered and the tile
    # fits the scoped-VMEM default on every generation (~320*bm bytes).
    BM_MAX = 16384
    if M <= BM_MAX:
        bm = ((M + 127) // 128) * 128
    else:
        bm = BM_MAX
    M_pad = ((M + bm - 1) // bm) * bm
    n_blocks = M_pad // bm

    # --- im2col + bias-fold (layout plumbing only, done by XLA) ------------
    # P[c*KH*KW + kh*KW + kw, n*OH*OW + oh*OW + ow] = x[n, c, oh+kh, ow+kw]
    taps = [x_nchw[:, :, kh:kh + OH, kw:kw + OW]          # (N, C, OH, OW)
            for kh in range(KH) for kw in range(KW)]
    p = jnp.stack(taps, axis=2)                           # (N, C, KH*KW, OH, OW)
    p = p.transpose(1, 2, 0, 3, 4).reshape(CKK, M)        # (CKK, M)
    p = jnp.concatenate([p, jnp.ones((1, M), p.dtype)], axis=0)   # ones row
    p = jnp.pad(p, ((0, CKK_pad - CKKb), (0, M_pad - M)))          # (CKK_pad, M_pad)

    w2d = jnp.concatenate(
        [w_oihw.reshape(OC, CKK), bias.reshape(OC, 1)], axis=1)    # (OC, CKK+1)
    w2d = jnp.pad(w2d, ((0, OC_pad - OC), (0, CKK_pad - CKKb)))    # (OC_pad, CKK_pad)

    cost = pl.CostEstimate(
        flops=2 * OC_pad * CKK_pad * M_pad,
        transcendentals=0,
        bytes_accessed=4 * (OC_pad * CKK_pad + CKK_pad * M_pad + OC_pad * M_pad),
    )

    out_t = pl.pallas_call(
        _matmul_kernel,
        out_shape=jax.ShapeDtypeStruct((OC_pad, M_pad), x_nchw.dtype),
        grid_spec=pltpu.PrefetchScalarGridSpec(
            num_scalar_prefetch=0,
            grid=(n_blocks,),
            in_specs=[
                pl.BlockSpec((OC_pad, CKK_pad), lambda i: (0, 0)),  # resident W
                pl.BlockSpec((CKK_pad, bm), lambda i: (0, i)),      # patch tile
            ],
            out_specs=pl.BlockSpec((OC_pad, bm), lambda i: (0, i)),
        ),
        compiler_params=pltpu.CompilerParams(
            dimension_semantics=("parallel",),
            # Fuse only the tiny weight/bias flatten; keep the im2col gather
            # as a plain XLA producer outside the Mosaic call region.
            allow_input_fusion=[True, False],
        ),
        cost_estimate=cost,
        interpret=interpret,
    )(w2d, p)

    # Un-pad and restore PyTorch's NCHW output convention.
    out = out_t[:OC, :M].reshape(OC, N, OH, OW).transpose(1, 0, 2, 3)
    return out                                            # (N, OC, OH, OW)


if __name__ == "__main__":
    key = jax.random.PRNGKey(0)
    k_x, k_w, k_b = jax.random.split(key, 3)

    # Shapes consistent with Conv2d(3 -> 6, k=3): x is (N=2, C=3, H=16, W=16).
    N, C, H, W = 2, 3, 16, 16
    OC, KH, KW = 6, 3, 3

    x = jax.random.normal(k_x, (N, C, H, W), dtype=jnp.float32)
    # Deterministic parameter init (uniform in +/- 1/sqrt(fan_in), PyTorch-style).
    fan_in = C * KH * KW
    bound = 1.0 / (fan_in ** 0.5)
    w = jax.random.uniform(k_w, (OC, C, KH, KW), jnp.float32, -bound, bound)
    b = jax.random.uniform(k_b, (OC,), jnp.float32, -bound, bound)

    out = jax.block_until_ready(conv2d_pallas(x, w, b))

    # Cross-check against XLA's conv (plain JAX reference).
    ref = jax.lax.conv_general_dilated(
        x, w, window_strides=(1, 1), padding="VALID",
        dimension_numbers=("NCHW", "OIHW", "NCHW"),
    ) + b.reshape(1, OC, 1, 1)
    assert out.shape == (N, OC, H - KH + 1, W - KW + 1)
    assert jnp.max(jnp.abs(out - ref)) < 1e-4

    print("KERNEL_OK")
</pallas_src>

<mosaic_0001>
module attributes {stable_mosaic.version = 11 : i64} {
  func.func @_matmul_kernel(%arg0: i32, %arg1: memref<8x32xf32, #tpu.memory_space<vmem>>, %arg2: memref<32x512xf32, #tpu.memory_space<vmem>>, %arg3: memref<8x512xf32, #tpu.memory_space<vmem>>) attributes {dimension_semantics = [#tpu.dimension_semantics<parallel>], iteration_bounds = array<i64: 1>, scalar_prefetch = 0 : i64, scratch_operands = 0 : i64, tpu.core_type = #tpu.core_type<tc>, window_params = [{pipeline_mode = #tpu.pipeline_mode<synchronous>, transform_indices = @transform_0, window_bounds = array<i64: 8, 32>}, {transform_indices = @transform_1, window_bounds = array<i64: 32, 512>}, {transform_indices = @transform_2, window_bounds = array<i64: 8, 512>}]} {
    %c0 = arith.constant 0 : index
    %c0_0 = arith.constant 0 : index
    %0 = vector.load %arg1[%c0, %c0_0] : memref<8x32xf32, #tpu.memory_space<vmem>>, vector<8x32xf32>
    %c0_1 = arith.constant 0 : index
    %c0_2 = arith.constant 0 : index
    %1 = vector.load %arg2[%c0_1, %c0_2] : memref<32x512xf32, #tpu.memory_space<vmem>>, vector<32x512xf32>
    %cst = arith.constant dense<0.000000e+00> : vector<8x512xf32>
    %2 = tpu.matmul %0, %1, %cst {dimension_numbers = #tpu.dot_dimension_numbers<[1], [0], [0], [1], [0, 0, 1, 1], [], []>} : vector<8x32xf32>, vector<32x512xf32>, vector<8x512xf32> -> vector<8x512xf32>
    %c0_3 = arith.constant 0 : index
    %c0_4 = arith.constant 0 : index
    %3 = vector.load %arg3[%c0_3, %c0_4] : memref<8x512xf32, #tpu.memory_space<vmem>>, vector<8x512xf32>
    tpu.vector_store %arg3[%c0_3, %c0_4], %2 {strides = array<i32>} : memref<8x512xf32, #tpu.memory_space<vmem>>, vector<8x512xf32>,
    return
  }
  func.func @transform_0(%arg0: i32) -> (i32, i32) {
    %c0_i32 = arith.constant 0 : i32
    %c0_i32_0 = arith.constant 0 : i32
    %c0_i32_1 = arith.constant 0 : i32
    return %c0_i32, %c0_i32_0 : i32, i32
  }
  func.func @transform_1(%arg0: i32) -> (i32, i32) {
    %c0_i32 = arith.constant 0 : i32
    %c0_i32_0 = arith.constant 0 : i32
    return %c0_i32, %arg0 : i32, i32
  }
  func.func @transform_2(%arg0: i32) -> (i32, i32) {
    %c0_i32 = arith.constant 0 : i32
    %c0_i32_0 = arith.constant 0 : i32
    return %c0_i32, %arg0 : i32, i32
  }
}

</mosaic_0001>

<bundles_post_ra>
// kernel: tpu_custom_call.1
= control target key start
LH: loop header
LB: loop body
LE: loop exit
PB: predicated region body
PF: predicated region fallthrough
CT: control target
= control target key end

     0   :  { %7 = vsyncpa [#allocation3], 0  ;;  %s285_s0 = inlined_call_operand.hbm [shape: f32[8,32], index: 0, kind: input, shape index: {}]   ;;  %s286_s1 = inlined_call_operand.hbm [shape: f32[32,512], index: 1, kind: input, shape index: {}]   ;;  %s287_s2 = inlined_call_operand.hbm [shape: f32[8,512], index: 2, kind: output, shape index: {}]  }
   0x1   :  { %8 = vsyncpa [#allocation6], 0 }
   0x2   :  { %9 = vsyncpa [#allocation4], 0  ;;  %s15_s11 = sshll.u32 %s285_s0, 4  ;;  %s252_s12 = smov [#allocation2]   ;;  %s16_s11 = int_to_ptr.hbm [resolvable:$true] %s15_s11 }
   0x3   :  { %s17_s13 = sshll.u32 %s252_s12, 4  ;;  %s25_s16 = sshll.u32 %s286_s1, 4  ;;  %s18_s13 = int_to_ptr.vmem [resolvable:$true] %s17_s13  ;;  %s26_s16 = int_to_ptr.hbm [resolvable:$true] %s25_s16 }
   0x4   :  { %20 = dma.hbm_to_vmem [thread:$0]  %s16_s11, 128, %s18_s13, [#allocation3]  }
   0x5   :  { %s253_s17 = smov [#allocation5]   ;;  %s254_s19 = smov 512  }
   0x6   :  { %s27_s18 = sshll.u32 %s253_s17, 4  ;;  %s255_s20 = smov 32   ;;  %s28_s18 = int_to_ptr.vmem [resolvable:$true] %s27_s18 }
   0x7   :  { %33 = dma.hbm_to_vmem [thread:$0]  %s26_s16, 2048, %s28_s18, [#allocation6], %s254_s19, %s254_s19, %s255_s20  }
   0x8   :  { %246 = dma.done.wait [#allocation3], 128  }
   0x9   :  { %247 = vsyncadd [#allocation3], 4294967168 }
   0xa   :  { %248 = dma.done.wait [#allocation6], 2048  }
   0xb   :  { %249 = vsyncadd [#allocation6], 4294965248  ;;  %v57_v0 = vld [vmem:[#allocation5 + $0x70] sm:$0xff]  ;;  %v58_v1 = vld [vmem:[#allocation5 + $0x78] sm:$0xff]  ;;  %vm59_vm0 = vcmask 261120   ;;  %s256_s0 = smov [#allocation7]  }
   0xc   :  { %v53_v2 = vld [vmem:[#allocation5 + $0x50] sm:$0xff]  ;;  %115 = vmatpush.msra.mxu2 %v57_v0  ;;  %135 = vmatpush.msra.mxu3 %v58_v1  ;;  %v54_v3 = vld [vmem:[#allocation5 + $0x58] sm:$0xff]  ;;  %v55_v6 = vld [vmem:[#allocation5 + $0x60] sm:$0xff]  ;;  %s152_s1 = sshll.u32 %s256_s0, 4  ;;  %s154_s23 = sshll.u32 %s287_s2, 4  ;;  %s153_s1 = int_to_ptr.vmem [resolvable:$true] %s152_s1  ;;  %s155_s23 = int_to_ptr.hbm [resolvable:$true] %s154_s23 }
   0xd   :  { %v49_v4 = vld [vmem:[#allocation5 + $0x30] sm:$0xff]  ;;  %v50_v5 = vld [vmem:[#allocation5 + $0x38] sm:$0xff]  ;;  %v56_v7 = vld [vmem:[#allocation5 + $0x68] sm:$0xff]  ;;  %75 = vmatpush.msra.mxu0 %v55_v6 }
   0xe   :  { %116 = vmatpush.msra.mxu2 %v53_v2  ;;  %136 = vmatpush.msra.mxu3 %v54_v3  ;;  %v51_v8 = vld [vmem:[#allocation5 + $0x40] sm:$0xff]  ;;  %v45_v9 = vld [vmem:[#allocation5 + $0x10] sm:$0xff]  ;;  %v46_v10 = vld [vmem:[#allocation5 + $0x18] sm:$0xff] }
   0xf   :  { %95 = vmatpush.msra.mxu1 %v56_v7  ;;  %v52_v11 = vld [vmem:[#allocation5 + $0x48] sm:$0xff]  ;;  %v42_v12 = vld [vmem:[#allocation2] sm:$0xff]  ;;  %76 = vmatpush.msra.mxu0 %v51_v8  ;;  %v47_v13 = vld [vmem:[#allocation5 + $0x20] sm:$0xff] }
  0x10   :  { %117 = vmatpush.msra.mxu2 %v49_v4  ;;  %137 = vmatpush.msra.mxu3 %v50_v5  ;;  %v48_v14 = vld [vmem:[#allocation5 + $0x28] sm:$0xff]  ;;  %v43_v15 = vld [vmem:[#allocation5] sm:$0xff] }
  0x11   :  { %96 = vmatpush.msra.mxu1 %v52_v11  ;;  %v44_v16 = vld [vmem:[#allocation5 + $0x8] sm:$0xff]  ;;  %77 = vmatpush.msra.mxu0 %v47_v13 }
  0x12   :  { %118 = vmatpush.msra.mxu2 %v45_v9  ;;  %138 = vmatpush.msra.mxu3 %v46_v10 }
  0x13   :  { %167 = vmatmul.msk.f32.vlgmr.msra.gmra.mxu2 %vm59_vm0, %v42_v12  ;;  %168 = vmatmul.msk.f32.vlgmr.msra.gmra.mxu3 %vm59_vm0, %v42_v12 }
  0x14   :  { %97 = vmatpush.msra.mxu1 %v48_v14  ;;  %78 = vmatpush.msra.mxu0 %v43_v15 }
  0x15   :  { %165 = vmatmul.msk.f32.vlgmr.msra.gmra.mxu0 %vm59_vm0, %v42_v12 }
  0x16   :  { %98 = vmatpush.msra.mxu1 %v44_v16 }
  0x17   :  { %166 = vmatmul.msk.f32.vlgmr.msra.gmra.mxu1 %vm59_vm0, %v42_v12 }
  0x92   :  { %v80_v17 = vpop.f32.mrf.mxu0 }
  0x93   :  { %143 = vst [vmem:[#allocation7] sm:$0xff] %v80_v17 }
  0x94   :  { %v100_v18 = vpop.f32.mrf.mxu1 }
  0x95   :  { %144 = vst [vmem:[#allocation7 + $0x8] sm:$0xff] %v100_v18 }
  0x96   :  { %v120_v19 = vpop.f32.mrf.mxu2  ;;  %v140_v20 = vpop.f32.mrf.mxu3 }
  0x97   :  { %145 = vst [vmem:[#allocation7 + $0x10] sm:$0xff] %v120_v19 }
  0x98   :  { %146 = vst [vmem:[#allocation7 + $0x18] sm:$0xff] %v140_v20 }
  0x99   :  { %157 = dma.vmem_to_hbm [thread:$0]  %s153_s1, 512, %s155_s23, [#allocation4]  }
  0x9a   :  { %250 = dma.done.wait [#allocation4], 512  }
  0x9b   :  { %251 = vsyncadd [#allocation4], 4294966784 }
  0x9c   :  { %162 = vsyncpa [#allocation3], 1 }
  0x9d   :  { %163 = vsyncpa [#allocation6], 1 }
  0x9e   :  { %164 = vsyncpa [#allocation4], 1 }

</bundles_post_ra>
